<compile_context>
chip_gen: v7x
topology: tpu7x:2x2x1
jax: 0.10.0
libtpu: 0.0.40
codegen_flags: <defaults>
</compile_context>

<pallas_src>
import jax
import jax.numpy as jnp
from jax.experimental import pallas as pl
from jax.experimental.pallas import tpu as pltpu

_LANES = 128
# Below this many (rows of 128 lanes) a single block is used: per-step grid
# overhead would otherwise dominate and there is nothing to shard.
_MIN_SPLIT_ROWS = 1024
# Hard upper bound on tile rows (16384 rows x 128 lanes x 4 B = 8 MiB f32).
_MAX_TILE_ROWS = 16384
# Budget for ONE set of (x, mask, out) tiles; Pallas double-buffers, so the
# resident set is ~2x this (<= ~40 MiB), inside v7x's 64 MiB physical VMEM.
_TILE_SET_BUDGET = 20 << 20
# Scoped VMEM cap: leaves headroom for compiler scratch on v7x; well under
# v5e/v6e's 128 MiB physical VMEM.
_VMEM_CAP = 48 << 20


def _round_up(v: int, m: int) -> int:
    return ((v + m - 1) // m) * m


def _weight_mask_kernel(x_ref, m_ref, o_ref):
    # Pure VPU elementwise product. Operands may arrive in narrower dtypes
    # (int8 / bf16 binary mask) to cut HBM traffic; the in-register upcast is
    # free — VALU slots have huge slack in a mem-bound kernel — and exact for
    # binary / small-integer mask values.
    o_ref[...] = x_ref[...].astype(o_ref.dtype) * m_ref[...].astype(o_ref.dtype)


def _choose_tile_rows(rows: int, bytes_per_row: int) -> int:
    """Pick tile rows: big enough to amortize per-step overhead, small enough
    to fit the VMEM budget, and >= 2 (even) blocks for v7x megacore sharding."""
    max_tile_rows = min(
        _MAX_TILE_ROWS,
        max(8, (_TILE_SET_BUDGET // bytes_per_row) // 8 * 8),
    )
    if rows <= _MIN_SPLIT_ROWS:
        # Tiny input: one full-array block (always a legal block shape).
        return rows
    if rows <= 2 * max_tile_rows:
        # Medium input: split into exactly 2 blocks so both v7x TensorCores
        # get work (no effect on single-TC v5e/v6e).
        return min(_round_up(pl.cdiv(rows, 2), 8), rows)
    # Large input: as-big-as-budget tiles, preferring an even block count so
    # the two v7x TensorCores stay balanced.
    nblocks = pl.cdiv(rows, max_tile_rows)
    if nblocks % 2:
        nblocks += 1
    return _round_up(pl.cdiv(rows, nblocks), 8)


def _weight_mask_2d(x2: jax.Array, m2: jax.Array, out_dtype,
                    *, donate_x: bool = False) -> jax.Array:
    """Elementwise product of two (rows, 128) lane-dense slabs."""
    rows, lanes = x2.shape
    out_itemsize = jnp.dtype(out_dtype).itemsize
    bytes_per_row = lanes * (x2.dtype.itemsize + m2.dtype.itemsize + out_itemsize)

    tile_rows = _choose_tile_rows(rows, bytes_per_row)
    grid = (pl.cdiv(rows, tile_rows),)

    tile_bytes = tile_rows * bytes_per_row
    # 2x for double buffering + headroom; never below the v6e/v7x default
    # scoped limit and never above the v7x-safe 48 MiB cap.
    vmem_limit = int(min(max(2 * tile_bytes + (8 << 20), 32 << 20), _VMEM_CAP))

    # Alias the output onto X's buffer only when dtypes match; safe because
    # in/out index_maps are identical and blocks are streamed one at a time.
    # (Callers must also donate X at the jit boundary and not reuse it.)
    aliases = {0: 0} if (donate_x and x2.dtype == jnp.dtype(out_dtype)) else {}

    return pl.pallas_call(
        _weight_mask_kernel,
        out_shape=jax.ShapeDtypeStruct((rows, lanes), out_dtype),
        grid_spec=pltpu.PrefetchScalarGridSpec(
            num_scalar_prefetch=0,
            grid=grid,
            in_specs=[
                pl.BlockSpec((tile_rows, lanes), lambda i: (i, 0)),
                pl.BlockSpec((tile_rows, lanes), lambda i: (i, 0)),
            ],
            out_specs=pl.BlockSpec((tile_rows, lanes), lambda i: (i, 0)),
        ),
        compiler_params=pltpu.CompilerParams(
            dimension_semantics=("parallel",),
            vmem_limit_bytes=vmem_limit,
        ),
        cost_estimate=pl.CostEstimate(
            flops=rows * lanes,
            transcendentals=0,
            bytes_accessed=rows * bytes_per_row,
        ),
        input_output_aliases=aliases,
    )(x2, m2)


def weight_mask(x: jax.Array, w_mask: jax.Array, *, donate_x: bool = False) -> jax.Array:
    """Computes X * W_mask (elementwise) with a Pallas TPU kernel.

    Mask dtype contract: pass binary masks as int8 (or bool, converted here)
    for minimum HBM traffic; float masks of any value are also supported with
    exact multiply semantics.
    """
    assert x.shape == w_mask.shape, "W_mask must match X's shape"
    orig_shape = x.shape

    if w_mask.dtype == jnp.bool_:
        # PyTorch promotes bool -> float in X * mask; int8 keeps the kernel
        # path simple, is exact for {0, 1}, and reads only 1 byte/elem.
        w_mask = w_mask.astype(jnp.int8)

    out_dtype = jnp.promote_types(x.dtype, w_mask.dtype)

    total = x.size
    if total == 0:
        return jnp.zeros(orig_shape, out_dtype)

    if total % _LANES != 0:
        # Rare path (flat size not a multiple of 128): a single fused XLA
        # multiply already does the minimum traffic (read x, read mask, write
        # out, one pass). Any kernel + pad/concat stitching would add a full
        # extra HBM pass, so just let XLA handle it.
        return (x.astype(out_dtype) * w_mask.astype(out_dtype)).reshape(orig_shape)

    rows = total // _LANES
    # Contiguous (row-major) reshape: no HBM copy. Strided/transposed inputs
    # would force a relayout copy here — keep X in default layout.
    x2 = jnp.reshape(x, (rows, _LANES))
    m2 = jnp.reshape(w_mask, (rows, _LANES))
    out2 = _weight_mask_2d(x2, m2, out_dtype, donate_x=donate_x)
    return out2.reshape(orig_shape)


if __name__ == "__main__":
    key = jax.random.PRNGKey(0)
    kx, km = jax.random.split(key)

    # Small NCHW input consistent with a conv-weight-mask use case.
    B, C, H, W = 2, 4, 16, 16
    x = jax.random.normal(kx, (B, C, H, W), dtype=jnp.float32)
    # Binary mask stored as int8: 1 B/elem of mask HBM read instead of 4,
    # exact for {0, 1}.
    w_mask = (jax.random.uniform(km, (B, C, H, W)) > 0.5).astype(jnp.int8)

    out = weight_mask(x, w_mask)
    jax.block_until_ready(out)

    ref = x * w_mask.astype(jnp.float32)
    assert out.shape == ref.shape and out.dtype == ref.dtype
    assert jnp.allclose(out, ref), "mismatch vs reference (int8 mask)"

    # Non-binary float mask: exact multiply semantics, same kernel.
    w_mask_f = jax.random.uniform(km, (B, C, H, W), dtype=jnp.float32)
    out_f = weight_mask(x, w_mask_f)
    jax.block_until_ready(out_f)
    assert jnp.allclose(out_f, x * w_mask_f), "mismatch vs reference (f32 mask)"

    # Medium shape: exercises the 2-block split path (v7x megacore sharding).
    km2, kx2 = jax.random.split(km)
    x_m = jax.random.normal(kx2, (2, 8, 96, 128), dtype=jnp.float32)
    m_m = (jax.random.uniform(km2, (2, 8, 96, 128)) > 0.5).astype(jnp.int8)
    out_m = weight_mask(x_m, m_m)
    jax.block_until_ready(out_m)
    assert jnp.allclose(out_m, x_m * m_m.astype(jnp.float32)), "mismatch (split path)"

    print("KERNEL_OK")
</pallas_src>

<mosaic_0001>
module attributes {stable_mosaic.version = 11 : i64} {
  func.func @_weight_mask_kernel(%arg0: i32, %arg1: memref<16x128xf32, #tpu.memory_space<vmem>>, %arg2: memref<16x128xi8, #tpu.memory_space<vmem>>, %arg3: memref<16x128xf32, #tpu.memory_space<vmem>>) attributes {dimension_semantics = [#tpu.dimension_semantics<parallel>], iteration_bounds = array<i64: 1>, scalar_prefetch = 0 : i64, scratch_operands = 0 : i64, tpu.core_type = #tpu.core_type<tc>, window_params = [{transform_indices = @transform_0, window_bounds = array<i64: 16, 128>}, {transform_indices = @transform_1, window_bounds = array<i64: 16, 128>}, {transform_indices = @transform_2, window_bounds = array<i64: 16, 128>}]} {
    %c0 = arith.constant 0 : index
    %c0_0 = arith.constant 0 : index
    %0 = vector.load %arg1[%c0, %c0_0] : memref<16x128xf32, #tpu.memory_space<vmem>>, vector<16x128xf32>
    %c0_1 = arith.constant 0 : index
    %c0_2 = arith.constant 0 : index
    %1 = vector.load %arg2[%c0_1, %c0_2] : memref<16x128xi8, #tpu.memory_space<vmem>>, vector<16x128xi8>
    %2 = arith.sitofp %1 : vector<16x128xi8> to vector<16x128xf32>
    %3 = arith.mulf %0, %2 : vector<16x128xf32>
    %c0_3 = arith.constant 0 : index
    %c0_4 = arith.constant 0 : index
    %4 = vector.load %arg3[%c0_3, %c0_4] : memref<16x128xf32, #tpu.memory_space<vmem>>, vector<16x128xf32>
    tpu.vector_store %arg3[%c0_3, %c0_4], %3 {strides = array<i32>} : memref<16x128xf32, #tpu.memory_space<vmem>>, vector<16x128xf32>,
    return
  }
  func.func @transform_0(%arg0: i32) -> (i32, i32) {
    %c0_i32 = arith.constant 0 : i32
    %c0_i32_0 = arith.constant 0 : i32
    return %arg0, %c0_i32 : i32, i32
  }
  func.func @transform_1(%arg0: i32) -> (i32, i32) {
    %c0_i32 = arith.constant 0 : i32
    %c0_i32_0 = arith.constant 0 : i32
    return %arg0, %c0_i32 : i32, i32
  }
  func.func @transform_2(%arg0: i32) -> (i32, i32) {
    %c0_i32 = arith.constant 0 : i32
    %c0_i32_0 = arith.constant 0 : i32
    return %arg0, %c0_i32 : i32, i32
  }
}

</mosaic_0001>

<bundles_post_ra>
// kernel: tpu_custom_call.1
= control target key start
LH: loop header
LB: loop body
LE: loop exit
PB: predicated region body
PF: predicated region fallthrough
CT: control target
= control target key end

     0   :  { %7 = vsyncpa [#allocation3], 0  ;;  %s217_s0 = inlined_call_operand.hbm [shape: f32[16,128], index: 0, kind: input, shape index: {}]   ;;  %s218_s1 = inlined_call_operand.hbm [shape: s8[16,128], index: 1, kind: input, shape index: {}]   ;;  %s219_s2 = inlined_call_operand.hbm [shape: f32[16,128], index: 2, kind: output, shape index: {}]  }
   0x1   :  { %8 = vsyncpa [#allocation6], 0 }
   0x2   :  { %9 = vsyncpa [#allocation4], 0  ;;  %s153_s9 = smov [#allocation2]   ;;  %s81_s13 = scalar_lea.hbm %s217_s0, 256 }
   0x3   :  { %s15_s10 = sshll.u32 %s153_s9, 4  ;;  %p82_p0 = scmp.ne.s32.totalorder %s217_s0, %s81_s13  ;;  %s16_s10 = int_to_ptr.vmem [resolvable:$true] %s15_s10 }
   0x4   :  { %p85_p1 = scmp.lt.u32.totalorder %s81_s13, %s217_s0 }
   0x6   :  { %p87_p2 = pnand %p85_p1, %p82_p0 }
   0x8   :  { %90 = shalt.err (!%p87_p2)
}
   0x9   :  { %s91_s18 = scalar_lea.vmem %s16_s10, 256  ;;  %p96_p4 = scmp.lt.s32.totalorder %s16_s10, %s16_s10 }
   0xa   :  { %p92_p3 = scmp.ne.s32.totalorder %s16_s10, %s91_s18  ;;  %p97_p5 = scmp.lt.s32.totalorder %s91_s18, %s91_s18 }
   0xc   :  { %p98_p6 = por %p97_p5, %p96_p4 }
   0xe   :  { %p99_p7 = pnand %p98_p6, %p92_p3 }
  0x10   :  { %102 = shalt.err (!%p99_p7)
}
  0x11   :  { %s154_s19 = smov 128   ;;  %s155_s20 = smov 8  }
  0x12   :  { %21 = dma.hbm_to_vmem [thread:$0]  %s217_s0, 256, %s16_s10, [#allocation3], %s154_s19, %s154_s19, %s155_s20  }
  0x13   :  { %s156_s23 = smov [#allocation5]   ;;  %s103_s27 = scalar_lea.hbm %s218_s1, 64 }
  0x14   :  { %s27_s24 = sshll.u32 %s156_s23, 4  ;;  %p104_p8 = scmp.ne.s32.totalorder %s218_s1, %s103_s27  ;;  %s28_s24 = int_to_ptr.vmem [resolvable:$true] %s27_s24 }
  0x15   :  { %p107_p9 = scmp.lt.u32.totalorder %s103_s27, %s218_s1 }
  0x17   :  { %p109_p10 = pnand %p107_p9, %p104_p8 }
  0x19   :  { %112 = shalt.err (!%p109_p10)
}
  0x1a   :  { %s113_s4 = scalar_lea.vmem %s28_s24, 64  ;;  %p118_p12 = scmp.lt.s32.totalorder %s28_s24, %s28_s24 }
  0x1b   :  { %p114_p11 = scmp.ne.s32.totalorder %s28_s24, %s113_s4  ;;  %p119_p13 = scmp.lt.s32.totalorder %s113_s4, %s113_s4 }
  0x1d   :  { %p120_p0 = por %p119_p13, %p118_p12 }
  0x1f   :  { %p121_p1 = pnand %p120_p0, %p114_p11 }
  0x21   :  { %124 = shalt.err (!%p121_p1)
}
  0x22   :  { %s157_s0 = smov 32   ;;  %s158_s5 = smov 2  }
  0x23   :  { %33 = dma.hbm_to_vmem [thread:$0]  %s218_s1, 64, %s28_s24, [#allocation6], %s157_s0, %s157_s0, %s158_s5  }
  0x24   :  { %147 = dma.done.wait [#allocation3], 256  }
  0x25   :  { %148 = vsyncadd [#allocation3], 4294967040 }
  0x26   :  { %149 = dma.done.wait [#allocation6], 64  }
  0x27   :  { %150 = vsyncadd [#allocation6], 4294967232  ;;  %v71_v0 = vld [vmem:[#allocation5] sm:$0xf]   ;;  %v40_v3 = vld [vmem:[#allocation2] sm:$0xff]  ;;  %s159_s8 = smov [#allocation7]  }
  0x28   :  { %v72_v1 = vunpack.c.0.s8 %v71_v0  ;;  %v73_v2 = vunpack.c.1.s8 %v71_v0  ;;  %v41_v4 = vld [vmem:[#allocation2 + $0x8] sm:$0xff]  ;;  %s57_s9 = sshll.u32 %s159_s8, 4  ;;  %s58_s9 = int_to_ptr.vmem [resolvable:$true] %s57_s9 }
  0x29   :  { %s125_s10 = scalar_lea.vmem %s58_s9, 256  ;;  %p130_p3 = scmp.lt.s32.totalorder %s58_s9, %s58_s9 }
  0x2a   :  { %v46_v5 = vcvt.s32.f32 %v72_v1  ;;  %v47_v6 = vcvt.s32.f32 %v73_v2  ;;  %p126_p2 = scmp.ne.s32.totalorder %s58_s9, %s125_s10  ;;  %p131_p4 = scmp.lt.s32.totalorder %s125_s10, %s125_s10 }
  0x2c   :  { %v48_v7 = vmul.f32 %v46_v5, %v40_v3  ;;  %v49_v8 = vmul.f32 %v47_v6, %v41_v4  ;;  %p132_p5 = por %p131_p4, %p130_p3 }
  0x2e   :  { %50 = vst [vmem:[#allocation7] sm:$0xff] %v48_v7  ;;  %51 = vst [vmem:[#allocation7 + $0x8] sm:$0xff] %v49_v8  ;;  %p133_p6 = pnand %p132_p5, %p126_p2 }
  0x30   :  { %136 = shalt.err (!%p133_p6)
}
  0x31   :  { %s137_s12 = scalar_lea.hbm %s219_s2, 256 }
  0x32   :  { %p138_p7 = scmp.ne.s32.totalorder %s219_s2, %s137_s12  ;;  %p141_p8 = scmp.lt.u32.totalorder %s137_s12, %s219_s2 }
  0x34   :  { %p143_p9 = pnand %p141_p8, %p138_p7 }
  0x36   :  { %146 = shalt.err (!%p143_p9)
}
  0x37   :  { %63 = dma.vmem_to_hbm [thread:$0]  %s58_s9, 256, %s219_s2, [#allocation4], %s154_s19, %s154_s19, %s155_s20  }
  0x38   :  { %151 = dma.done.wait [#allocation4], 256  }
  0x39   :  { %152 = vsyncadd [#allocation4], 4294967040 }
  0x3a   :  { %67 = vsyncpa [#allocation3], 1 }
  0x3b   :  { %68 = vsyncpa [#allocation6], 1 }
  0x3c   :  { %69 = vsyncpa [#allocation4], 1 }

</bundles_post_ra>
